<compile_context>
chip_gen: v6e
topology: v6e:2x2x1
jax: 0.10.0
libtpu: 0.0.40
codegen_flags: <defaults>
</compile_context>

<pallas_src>
import jax
import jax.numpy as jnp
from jax.experimental import pallas as pl
from jax.experimental.pallas import tpu as pltpu

EPS = 1e-5

# ---- parameter-slab layout (rows x 128 lanes, f32) --------------------------
# rows  0:32 , cols  0:11 -> w1 (32, 11) ; col 11 -> g1 ; col 12 -> be1
# rows 32:64 , cols  0:32 -> w2 (32, 32) ; col 32 -> g2 ; col 33 -> be2
# rows 64:80 , cols  0:32 -> w3 (16, 32) ; col 32 -> g3 ; col 33 -> be3
# row  80    , cols  0:16 -> w4 (1, 16)  ; col 16 -> b4
_SLAB_ROWS = 88  # 81 used, padded to a multiple of 8 sublanes


def _bn_relu_t(h, gamma, beta, inv_n):
    """Training-mode BatchNorm1d + ReLU on (C, N) activations, single-pass stats.

    Batch axis is the lane axis (axis=1). gamma/beta are (C, 1) columns.
    """
    s1 = jnp.sum(h, axis=1, keepdims=True)                 # (C, 1)
    s2 = jnp.sum(h * h, axis=1, keepdims=True)             # (C, 1)
    mean = s1 * inv_n
    var = jnp.maximum(s2 * inv_n - mean * mean, 0.0)       # biased variance
    scale = gamma * jax.lax.rsqrt(var + EPS)               # fold BN affine
    shift = beta - mean * scale
    return jnp.maximum(h * scale + shift, 0.0)


def wine_q_kernel(x_ref, p_ref, o_ref):
    n = x_ref.shape[0]
    inv_n = 1.0 / n                                         # static

    x = x_ref[...]                                          # (N, 11)

    # Linear(11,32) [bias folded away by BN]: contract the feature axis of the
    # un-transposed (N, 11) input directly (A @ B^T on the MXU) -> (32, N).
    h = jax.lax.dot_general(
        p_ref[0:32, 0:11], x,
        dimension_numbers=(((1,), (1,)), ((), ())),
        preferred_element_type=jnp.float32)
    h = _bn_relu_t(h, p_ref[0:32, 11:12], p_ref[0:32, 12:13], inv_n)

    # Linear(32,32) -> BN(32) -> ReLU
    h = jnp.dot(p_ref[32:64, 0:32], h, preferred_element_type=jnp.float32)
    h = _bn_relu_t(h, p_ref[32:64, 32:33], p_ref[32:64, 33:34], inv_n)

    # Linear(32,16) -> BN(16) -> ReLU
    h = jnp.dot(p_ref[64:80, 0:32], h, preferred_element_type=jnp.float32)
    h = _bn_relu_t(h, p_ref[64:80, 32:33], p_ref[64:80, 33:34], inv_n)

    # Linear(16,1) -> ReLU  (bias kept: no BN after it)
    h = jnp.dot(p_ref[80:81, 0:16], h, preferred_element_type=jnp.float32)
    o_ref[...] = jnp.maximum(h + p_ref[80:81, 16:17], 0.0)  # (1, N), lane-dense


def pack_params(params):
    """Pack all parameters into one (88, 128) f32 slab. Do this ONCE per model;
    the hot path then ships exactly two inputs (x + slab) to the kernel."""
    (w1, b1, g1, be1, w2, b2, g2, be2, w3, b3, g3, be3, w4, b4) = params
    del b1, b2, b3  # exactly cancelled by the training-mode BN that follows

    slab = jnp.zeros((_SLAB_ROWS, 128), jnp.float32)
    slab = slab.at[0:32, 0:11].set(w1)
    slab = slab.at[0:32, 11].set(g1)
    slab = slab.at[0:32, 12].set(be1)
    slab = slab.at[32:64, 0:32].set(w2)
    slab = slab.at[32:64, 32].set(g2)
    slab = slab.at[32:64, 33].set(be2)
    slab = slab.at[64:80, 0:32].set(w3)
    slab = slab.at[64:80, 32].set(g3)
    slab = slab.at[64:80, 33].set(be3)
    slab = slab.at[80, 0:16].set(w4[0])
    slab = slab.at[80, 16].set(b4[0])
    return slab


def wine_q_forward(x, param_slab):
    """x: (N, 11) f32. param_slab: (88, 128) f32 from pack_params()."""
    n = x.shape[0]
    vmem = pl.BlockSpec(memory_space=pltpu.MemorySpace.VMEM)
    out_t = pl.pallas_call(
        wine_q_kernel,
        out_shape=jax.ShapeDtypeStruct((1, n), jnp.float32),  # lane-dense output
        in_specs=[vmem, vmem],
        out_specs=vmem,
        compiler_params=pltpu.CompilerParams(vmem_limit_bytes=32 * 1024 * 1024),
    )(x, param_slab)
    return out_t.T  # (N, 1)


def init_params(key):
    """Deterministic init mirroring the PyTorch module's parameter shapes.

    PyTorch layout: Linear weight (out, in), bias (out,); BN gamma/beta (C,).
    """
    dims = [(11, 32), (32, 32), (32, 16), (16, 1)]
    bn_dims = [32, 32, 16]
    params = []
    keys = jax.random.split(key, 16)
    ki = 0
    for li, (fin, fout) in enumerate(dims):
        bound = 1.0 / jnp.sqrt(float(fin))
        w = jax.random.uniform(keys[ki], (fout, fin), jnp.float32, -bound, bound)
        ki += 1
        b = jax.random.uniform(keys[ki], (fout,), jnp.float32, -bound, bound)
        ki += 1
        params.extend([w, b])
        if li < len(bn_dims):
            c = bn_dims[li]
            gamma = 1.0 + 0.1 * jax.random.normal(keys[ki], (c,), jnp.float32)
            ki += 1
            beta = 0.1 * jax.random.normal(keys[ki], (c,), jnp.float32)
            ki += 1
            params.extend([gamma, beta])
    return params


def reference_forward(x, params):
    """Pure-JAX reference in the original (N, F) layout, using ALL params
    (including the pre-BN biases) — validates the bias-folding identity and
    the single-pass variance rewrite."""
    (w1, b1, g1, be1, w2, b2, g2, be2, w3, b3, g3, be3, w4, b4) = params

    def bn_relu(h, g, be):
        m = jnp.mean(h, axis=0, keepdims=True)
        v = jnp.mean((h - m) ** 2, axis=0, keepdims=True)
        return jnp.maximum((h - m) / jnp.sqrt(v + EPS) * g + be, 0.0)

    h = bn_relu(x @ w1.T + b1, g1, be1)
    h = bn_relu(h @ w2.T + b2, g2, be2)
    h = bn_relu(h @ w3.T + b3, g3, be3)
    return jnp.maximum(h @ w4.T + b4, 0.0)


if __name__ == "__main__":
    key = jax.random.PRNGKey(0)
    k_x, k_p = jax.random.split(key)

    N = 128  # batch on lanes -> one full 128-lane vreg row per feature
    x = jax.random.normal(k_x, (N, 11), jnp.float32)
    params = init_params(k_p)
    slab = pack_params(params)          # one-time packing, outside the hot path

    out = wine_q_forward(x, slab)
    out = jax.block_until_ready(out)

    ref = reference_forward(x, params)
    assert out.shape == (N, 1)
    assert jnp.allclose(out, ref, atol=2e-4, rtol=2e-4), "mismatch vs reference"

    print("KERNEL_OK")
</pallas_src>

<mosaic_0001>
module attributes {stable_mosaic.version = 11 : i64} {
  func.func @wine_q_kernel(%arg0: memref<128x11xf32, #tpu.memory_space<vmem>>, %arg1: memref<88x128xf32, #tpu.memory_space<vmem>>, %arg2: memref<1x128xf32, #tpu.memory_space<vmem>>) attributes {dimension_semantics = [], scalar_prefetch = 0 : i64, scratch_operands = 0 : i64, tpu.core_type = #tpu.core_type<tc>} {
    %c0 = arith.constant 0 : index
    %c0_0 = arith.constant 0 : index
    %0 = vector.load %arg0[%c0, %c0_0] : memref<128x11xf32, #tpu.memory_space<vmem>>, vector<128x11xf32>
    %c0_1 = arith.constant 0 : index
    %c0_2 = arith.constant 0 : index
    %1 = vector.load %arg1[%c0_1, %c0_2] : memref<88x128xf32, #tpu.memory_space<vmem>>, vector<32x11xf32>
    %cst = arith.constant dense<0.000000e+00> : vector<32x128xf32>
    %2 = tpu.matmul %1, %0, %cst {dimension_numbers = #tpu.dot_dimension_numbers<[1], [1], [0], [0], [0, 0, 1, 0], [], []>} : vector<32x11xf32>, vector<128x11xf32>, vector<32x128xf32> -> vector<32x128xf32>
    %c0_3 = arith.constant 0 : index
    %c11 = arith.constant 11 : index
    %3 = vector.load %arg1[%c0_3, %c11] : memref<88x128xf32, #tpu.memory_space<vmem>>, vector<32x1xf32>
    %c0_4 = arith.constant 0 : index
    %c12 = arith.constant 12 : index
    %4 = vector.load %arg1[%c0_4, %c12] : memref<88x128xf32, #tpu.memory_space<vmem>>, vector<32x1xf32>
    %cst_5 = arith.constant dense<0.000000e+00> : vector<32xf32>
    %5 = vector.multi_reduction <add>, %2, %cst_5 [1] : vector<32x128xf32> to vector<32xf32>
    %6 = vector.shape_cast %5 : vector<32xf32> to vector<32x1xf32>
    %7 = arith.mulf %2, %2 : vector<32x128xf32>
    %cst_6 = arith.constant dense<0.000000e+00> : vector<32xf32>
    %8 = vector.multi_reduction <add>, %7, %cst_6 [1] : vector<32x128xf32> to vector<32xf32>
    %9 = vector.shape_cast %8 : vector<32xf32> to vector<32x1xf32>
    %cst_7 = arith.constant 7.812500e-03 : f32
    %10 = vector.broadcast %cst_7 : f32 to vector<32x1xf32>
    %11 = arith.mulf %6, %10 : vector<32x1xf32>
    %cst_8 = arith.constant 7.812500e-03 : f32
    %12 = vector.broadcast %cst_8 : f32 to vector<32x1xf32>
    %13 = arith.mulf %9, %12 : vector<32x1xf32>
    %14 = arith.mulf %11, %11 : vector<32x1xf32>
    %15 = arith.subf %13, %14 : vector<32x1xf32>
    %cst_9 = arith.constant 0.000000e+00 : f32
    %16 = vector.broadcast %cst_9 : f32 to vector<32x1xf32>
    %17 = arith.maximumf %15, %16 : vector<32x1xf32>
    %cst_10 = arith.constant 9.99999974E-6 : f32
    %18 = vector.broadcast %cst_10 : f32 to vector<32x1xf32>
    %19 = arith.addf %17, %18 : vector<32x1xf32>
    %20 = math.rsqrt %19 : vector<32x1xf32>
    %21 = arith.mulf %3, %20 : vector<32x1xf32>
    %22 = arith.mulf %11, %21 : vector<32x1xf32>
    %23 = arith.subf %4, %22 : vector<32x1xf32>
    %24 = vector.broadcast %21 : vector<32x1xf32> to vector<32x128xf32>
    %25 = arith.mulf %2, %24 : vector<32x128xf32>
    %26 = vector.broadcast %23 : vector<32x1xf32> to vector<32x128xf32>
    %27 = arith.addf %25, %26 : vector<32x128xf32>
    %cst_11 = arith.constant 0.000000e+00 : f32
    %28 = vector.broadcast %cst_11 : f32 to vector<32x128xf32>
    %29 = arith.maximumf %27, %28 : vector<32x128xf32>
    %c32 = arith.constant 32 : index
    %c0_12 = arith.constant 0 : index
    %30 = vector.load %arg1[%c32, %c0_12] : memref<88x128xf32, #tpu.memory_space<vmem>>, vector<32x32xf32>
    %cst_13 = arith.constant dense<0.000000e+00> : vector<32x128xf32>
    %31 = tpu.matmul %30, %29, %cst_13 {dimension_numbers = #tpu.dot_dimension_numbers<[1], [0], [0], [1], [0, 0, 1, 1], [], []>} : vector<32x32xf32>, vector<32x128xf32>, vector<32x128xf32> -> vector<32x128xf32>
    %c32_14 = arith.constant 32 : index
    %c32_15 = arith.constant 32 : index
    %32 = vector.load %arg1[%c32_14, %c32_15] : memref<88x128xf32, #tpu.memory_space<vmem>>, vector<32x1xf32>
    %c32_16 = arith.constant 32 : index
    %c33 = arith.constant 33 : index
    %33 = vector.load %arg1[%c32_16, %c33] : memref<88x128xf32, #tpu.memory_space<vmem>>, vector<32x1xf32>
    %cst_17 = arith.constant dense<0.000000e+00> : vector<32xf32>
    %34 = vector.multi_reduction <add>, %31, %cst_17 [1] : vector<32x128xf32> to vector<32xf32>
    %35 = vector.shape_cast %34 : vector<32xf32> to vector<32x1xf32>
    %36 = arith.mulf %31, %31 : vector<32x128xf32>
    %cst_18 = arith.constant dense<0.000000e+00> : vector<32xf32>
    %37 = vector.multi_reduction <add>, %36, %cst_18 [1] : vector<32x128xf32> to vector<32xf32>
    %38 = vector.shape_cast %37 : vector<32xf32> to vector<32x1xf32>
    %cst_19 = arith.constant 7.812500e-03 : f32
    %39 = vector.broadcast %cst_19 : f32 to vector<32x1xf32>
    %40 = arith.mulf %35, %39 : vector<32x1xf32>
    %cst_20 = arith.constant 7.812500e-03 : f32
    %41 = vector.broadcast %cst_20 : f32 to vector<32x1xf32>
    %42 = arith.mulf %38, %41 : vector<32x1xf32>
    %43 = arith.mulf %40, %40 : vector<32x1xf32>
    %44 = arith.subf %42, %43 : vector<32x1xf32>
    %cst_21 = arith.constant 0.000000e+00 : f32
    %45 = vector.broadcast %cst_21 : f32 to vector<32x1xf32>
    %46 = arith.maximumf %44, %45 : vector<32x1xf32>
    %cst_22 = arith.constant 9.99999974E-6 : f32
    %47 = vector.broadcast %cst_22 : f32 to vector<32x1xf32>
    %48 = arith.addf %46, %47 : vector<32x1xf32>
    %49 = math.rsqrt %48 : vector<32x1xf32>
    %50 = arith.mulf %32, %49 : vector<32x1xf32>
    %51 = arith.mulf %40, %50 : vector<32x1xf32>
    %52 = arith.subf %33, %51 : vector<32x1xf32>
    %53 = vector.broadcast %50 : vector<32x1xf32> to vector<32x128xf32>
    %54 = arith.mulf %31, %53 : vector<32x128xf32>
    %55 = vector.broadcast %52 : vector<32x1xf32> to vector<32x128xf32>
    %56 = arith.addf %54, %55 : vector<32x128xf32>
    %cst_23 = arith.constant 0.000000e+00 : f32
    %57 = vector.broadcast %cst_23 : f32 to vector<32x128xf32>
    %58 = arith.maximumf %56, %57 : vector<32x128xf32>
    %c64 = arith.constant 64 : index
    %c0_24 = arith.constant 0 : index
    %59 = vector.load %arg1[%c64, %c0_24] : memref<88x128xf32, #tpu.memory_space<vmem>>, vector<16x32xf32>
    %cst_25 = arith.constant dense<0.000000e+00> : vector<16x128xf32>
    %60 = tpu.matmul %59, %58, %cst_25 {dimension_numbers = #tpu.dot_dimension_numbers<[1], [0], [0], [1], [0, 0, 1, 1], [], []>} : vector<16x32xf32>, vector<32x128xf32>, vector<16x128xf32> -> vector<16x128xf32>
    %c64_26 = arith.constant 64 : index
    %c32_27 = arith.constant 32 : index
    %61 = vector.load %arg1[%c64_26, %c32_27] : memref<88x128xf32, #tpu.memory_space<vmem>>, vector<16x1xf32>
    %c64_28 = arith.constant 64 : index
    %c33_29 = arith.constant 33 : index
    %62 = vector.load %arg1[%c64_28, %c33_29] : memref<88x128xf32, #tpu.memory_space<vmem>>, vector<16x1xf32>
    %cst_30 = arith.constant dense<0.000000e+00> : vector<16xf32>
    %63 = vector.multi_reduction <add>, %60, %cst_30 [1] : vector<16x128xf32> to vector<16xf32>
    %64 = vector.shape_cast %63 : vector<16xf32> to vector<16x1xf32>
    %65 = arith.mulf %60, %60 : vector<16x128xf32>
    %cst_31 = arith.constant dense<0.000000e+00> : vector<16xf32>
    %66 = vector.multi_reduction <add>, %65, %cst_31 [1] : vector<16x128xf32> to vector<16xf32>
    %67 = vector.shape_cast %66 : vector<16xf32> to vector<16x1xf32>
    %cst_32 = arith.constant 7.812500e-03 : f32
    %68 = vector.broadcast %cst_32 : f32 to vector<16x1xf32>
    %69 = arith.mulf %64, %68 : vector<16x1xf32>
    %cst_33 = arith.constant 7.812500e-03 : f32
    %70 = vector.broadcast %cst_33 : f32 to vector<16x1xf32>
    %71 = arith.mulf %67, %70 : vector<16x1xf32>
    %72 = arith.mulf %69, %69 : vector<16x1xf32>
    %73 = arith.subf %71, %72 : vector<16x1xf32>
    %cst_34 = arith.constant 0.000000e+00 : f32
    %74 = vector.broadcast %cst_34 : f32 to vector<16x1xf32>
    %75 = arith.maximumf %73, %74 : vector<16x1xf32>
    %cst_35 = arith.constant 9.99999974E-6 : f32
    %76 = vector.broadcast %cst_35 : f32 to vector<16x1xf32>
    %77 = arith.addf %75, %76 : vector<16x1xf32>
    %78 = math.rsqrt %77 : vector<16x1xf32>
    %79 = arith.mulf %61, %78 : vector<16x1xf32>
    %80 = arith.mulf %69, %79 : vector<16x1xf32>
    %81 = arith.subf %62, %80 : vector<16x1xf32>
    %82 = vector.broadcast %79 : vector<16x1xf32> to vector<16x128xf32>
    %83 = arith.mulf %60, %82 : vector<16x128xf32>
    %84 = vector.broadcast %81 : vector<16x1xf32> to vector<16x128xf32>
    %85 = arith.addf %83, %84 : vector<16x128xf32>
    %cst_36 = arith.constant 0.000000e+00 : f32
    %86 = vector.broadcast %cst_36 : f32 to vector<16x128xf32>
    %87 = arith.maximumf %85, %86 : vector<16x128xf32>
    %c80 = arith.constant 80 : index
    %c0_37 = arith.constant 0 : index
    %88 = vector.load %arg1[%c80, %c0_37] : memref<88x128xf32, #tpu.memory_space<vmem>>, vector<1x16xf32>
    %cst_38 = arith.constant dense<0.000000e+00> : vector<1x128xf32>
    %89 = tpu.matmul %88, %87, %cst_38 {dimension_numbers = #tpu.dot_dimension_numbers<[1], [0], [0], [1], [0, 0, 1, 1], [], []>} : vector<1x16xf32>, vector<16x128xf32>, vector<1x128xf32> -> vector<1x128xf32>
    %c80_39 = arith.constant 80 : index
    %c16 = arith.constant 16 : index
    %90 = vector.load %arg1[%c80_39, %c16] : memref<88x128xf32, #tpu.memory_space<vmem>>, vector<1x1xf32>
    %91 = vector.broadcast %90 : vector<1x1xf32> to vector<1x128xf32>
    %92 = arith.addf %89, %91 : vector<1x128xf32>
    %cst_40 = arith.constant 0.000000e+00 : f32
    %93 = vector.broadcast %cst_40 : f32 to vector<1x128xf32>
    %94 = arith.maximumf %92, %93 : vector<1x128xf32>
    %c0_41 = arith.constant 0 : index
    %c0_42 = arith.constant 0 : index
    %95 = vector.load %arg2[%c0_41, %c0_42] : memref<1x128xf32, #tpu.memory_space<vmem>>, vector<1x128xf32>
    tpu.vector_store %arg2[%c0_41, %c0_42], %94 {strides = array<i32>} : memref<1x128xf32, #tpu.memory_space<vmem>>, vector<1x128xf32>,
    return
  }
}

</mosaic_0001>

<bundles_post_ra>
// kernel: tpu_custom_call.1
= control target key start
LH: loop header
LB: loop body
LE: loop exit
PB: predicated region body
PF: predicated region fallthrough
CT: control target
= control target key end

     0   :  { %vm32_vm0 = vcmask 89088   ;;  %s1233_s0 = inlined_call_operand.vmem [shape: f32[128,11], index: 0, kind: input, shape index: {}]   ;;  %s1234_s1 = inlined_call_operand.vmem [shape: f32[88,128], index: 1, kind: input, shape index: {}]   ;;  %s1235_s2 = inlined_call_operand.hbm [shape: f32[1,128], index: 2, kind: output, shape index: {}]  }
   0x1   :  { %v27_v0 = vld [vmem:[%s1233_s0 + $0x78] sm:$0xff]  ;;  %v26_v1 = vld [vmem:[%s1233_s0 + $0x70] sm:$0xff]  ;;  %v25_v2 = vld [vmem:[%s1233_s0 + $0x68] sm:$0xff] }
   0x2   :  { %842 = vmatprep.subr.msk.mxu0 %vm32_vm0, %v27_v0  ;;  %v1013_v3 = vld [vmem:[%s1234_s1] sm:$0xff] }
   0x3   :  { %843 = vmatpush3.xpose.msk.msra.mxu0 %vm32_vm0, %v27_v0  ;;  %874 = vmatprep.mubr.msk.f32.mxu0 %vm32_vm0, %v1013_v3 }
   0x4   :  { %844 = vmatprep.subr.msk.mxu0 %vm32_vm0, %v26_v1 }
   0x7   :  { %845 = vmatpush3.xpose.msk.msra.mxu0 %vm32_vm0, %v26_v1 }
   0x8   :  { %7 = vsyncpa [#allocation3], 0  ;;  %846 = vmatprep.subr.msk.mxu0 %vm32_vm0, %v25_v2  ;;  %v24_v4 = vld [vmem:[%s1233_s0 + $0x60] sm:$0xff]  ;;  %v23_v5 = vld [vmem:[%s1233_s0 + $0x58] sm:$0xff]  ;;  %v974_v28 = vmov 11   ;;  %s975_s20 = smov 1  }
   0x9   :  { %v22_v6 = vld [vmem:[%s1233_s0 + $0x50] sm:$0xff]  ;;  %v21_v7 = vld [vmem:[%s1233_s0 + $0x48] sm:$0xff]  ;;  %v20_v8 = vld [vmem:[%s1233_s0 + $0x40] sm:$0xff]  ;;  %921 = vset.pattern.permute.xlu0 %v974_v28  ;;  %922 = vset.pattern.permute.xlu1 %v974_v28  ;;  %vm310_vm1 = vcmask 261120   ;;  %vm980_vm2 = vmmov 0   ;;  %vm689_vm3 = vcmask 130048  }
   0xa   :  { %v19_v9 = vld [vmem:[%s1233_s0 + $0x38] sm:$0xff]  ;;  %v18_v10 = vld [vmem:[%s1233_s0 + $0x30] sm:$0xff]  ;;  %v17_v11 = vld [vmem:[%s1233_s0 + $0x28] sm:$0xff] }
   0xb   :  { %847 = vmatpush3.xpose.msk.msra.mxu0 %vm32_vm0, %v25_v2  ;;  %v16_v12 = vld [vmem:[%s1233_s0 + $0x20] sm:$0xff]  ;;  %v15_v13 = vld [vmem:[%s1233_s0 + $0x18] sm:$0xff]  ;;  %v14_v14 = vld [vmem:[%s1233_s0 + $0x10] sm:$0xff] }
   0xc   :  { %848 = vmatprep.subr.msk.mxu0 %vm32_vm0, %v24_v4  ;;  %v13_v15 = vld [vmem:[%s1233_s0 + $0x8] sm:$0xff]  ;;  %v12_v16 = vld [vmem:[%s1233_s0] sm:$0xff]  ;;  %v1093_v18 = vld [vmem:[%s1234_s1 + $0x10] sm:$0xff] }
   0xd   :  { %v1088_v17 = vld [vmem:[%s1234_s1 + $0x8] sm:$0xff]  ;;  %v1102_v19 = vld [vmem:[%s1234_s1 + $0x18] sm:$0xff] }
   0xf   :  { %849 = vmatpush3.xpose.msk.msra.mxu0 %vm32_vm0, %v24_v4 }
  0x10   :  { %850 = vmatprep.subr.msk.mxu0 %vm32_vm0, %v23_v5 }
  0x13   :  { %851 = vmatpush3.xpose.msk.msra.mxu0 %vm32_vm0, %v23_v5 }
  0x14   :  { %852 = vmatprep.subr.msk.mxu0 %vm32_vm0, %v22_v6 }
  0x17   :  { %853 = vmatpush3.xpose.msk.msra.mxu0 %vm32_vm0, %v22_v6 }
  0x18   :  { %854 = vmatprep.subr.msk.mxu0 %vm32_vm0, %v21_v7 }
  0x1b   :  { %855 = vmatpush3.xpose.msk.msra.mxu0 %vm32_vm0, %v21_v7 }
  0x1c   :  { %856 = vmatprep.subr.msk.mxu0 %vm32_vm0, %v20_v8 }
  0x1f   :  { %857 = vmatpush3.xpose.msk.msra.mxu0 %vm32_vm0, %v20_v8 }
  0x20   :  { %858 = vmatprep.subr.msk.mxu0 %vm32_vm0, %v19_v9 }
  0x23   :  { %859 = vmatpush3.xpose.msk.msra.mxu0 %vm32_vm0, %v19_v9 }
  0x24   :  { %860 = vmatprep.subr.msk.mxu0 %vm32_vm0, %v18_v10 }
  0x27   :  { %861 = vmatpush3.xpose.msk.msra.mxu0 %vm32_vm0, %v18_v10  ;;  %v976_v10 = vmov 12  }
  0x28   :  { %862 = vmatprep.subr.msk.mxu0 %vm32_vm0, %v17_v11 }
  0x2b   :  { %863 = vmatpush3.xpose.msk.msra.mxu0 %vm32_vm0, %v17_v11 }
  0x2c   :  { %864 = vmatprep.subr.msk.mxu0 %vm32_vm0, %v16_v12 }
  0x2f   :  { %865 = vmatpush3.xpose.msk.msra.mxu0 %vm32_vm0, %v16_v12 }
  0x30   :  { %866 = vmatprep.subr.msk.mxu0 %vm32_vm0, %v15_v13 }
  0x33   :  { %867 = vmatpush3.xpose.msk.msra.mxu0 %vm32_vm0, %v15_v13 }
  0x34   :  { %868 = vmatprep.subr.msk.mxu0 %vm32_vm0, %v14_v14 }
  0x37   :  { %869 = vmatpush3.xpose.msk.msra.mxu0 %vm32_vm0, %v14_v14 }
  0x38   :  { %870 = vmatprep.subr.msk.mxu0 %vm32_vm0, %v13_v15 }
  0x3b   :  { %871 = vmatpush3.xpose.msk.msra.mxu0 %vm32_vm0, %v13_v15 }
  0x3c   :  { %872 = vmatprep.subr.msk.mxu0 %vm32_vm0, %v12_v16 }
  0x3f   :  { %873 = vmatpush3.xpose.msk.msra.mxu0 %vm32_vm0, %v12_v16 }
  0x42   :  { %875 = vmatmul.mubr.msk.f32.vlgmr.msra.gmra.mxu0 %vm32_vm0, %v1088_v17 }
  0x43   :  { %877 = vmatprep.mubr.msk.f32.mxu0 %vm32_vm0, %v1093_v18 }
  0x46   :  { %878 = vmatmul.mubr.msk.f32.gmra.mxu0 %vm32_vm0, %v1102_v19 }
 0x102   :  { %v1106_v20 = vpop.f32.mrf.mxu0 }
 0x103   :  { %180 = vadd.xlane.f32.xlu1 %v1106_v20  ;;  %v187_v27 = vmul.f32 %v1106_v20, %v1106_v20 }
 0x104   :  { %v1109_v21 = vpop.f32.mrf.mxu0 }
 0x105   :  { %v186_v26 = vmul.f32 %v1109_v21, %v1109_v21 }
 0x106   :  { %v1111_v22 = vpop.f32.mrf.mxu0 }
 0x107   :  { %184 = vadd.xlane.f32.xlu0 %v1111_v22  ;;  %v189_v23 = vmul.f32 %v1111_v22, %v1111_v22 }
 0x108   :  { %v1116_v24 = vpop.f32.mrf.mxu0 }
 0x109   :  { %196 = vadd.xlane.f32.xlu1 %v189_v23  ;;  %v188_v25 = vmul.f32 %v1116_v24, %v1116_v24 }
 0x10b   :  { %182 = vadd.xlane.f32.xlu0 %v1116_v24 }
 0x10d   :  { %178 = vadd.xlane.f32.xlu1 %v1109_v21 }
 0x10f   :  { %194 = vadd.xlane.f32.xlu0 %v188_v25 }
 0x111   :  { %190 = vadd.xlane.f32.xlu1 %v186_v26  ;;  %v1141_v26 = vld [vmem:[%s1234_s1 + $0x20] sm:$0xff] }
 0x112   :  { %888 = vmatprep.mubr.msk.f32.mxu1 %vm310_vm1, %v1141_v26 }
 0x113   :  { %192 = vadd.xlane.f32.xlu0 %v187_v27 }
 0x18c   :  { %v181_v29 = vpop.xlane.xlu1 %180 }
 0x18d   :  { %v199_v42 = vmul.f32 0.0078125, %v181_v29 }
 0x18f   :  { %v207_v51 = vmul.f32 %v199_v42, %v199_v42 }
 0x190   :  { %v185_v30 = vpop.xlane.xlu0 %184 }
 0x191   :  { %v201_v31 = vmul.f32 0.0078125, %v185_v30 }
 0x192   :  { %v197_v32 = vpop.xlane.xlu1 %196 }
 0x193   :  { %v209_v33 = vmul.f32 %v201_v31, %v201_v31  ;;  %v205_v34 = vmul.f32 0.0078125, %v197_v32 }
 0x194   :  { %v183_v35 = vpop.xlane.xlu0 %182 }
 0x195   :  { %v213_v36 = vsub.f32 %v205_v34, %v209_v33  ;;  %v200_v37 = vmul.f32 0.0078125, %v183_v35 }
 0x196   :  { %v179_v38 = vpop.xlane.xlu1 %178 }
 0x197   :  { %v217_v39 = vmax.f32 %v213_v36, 0.0  ;;  %v198_v40 = vmul.f32 0.0078125, %v179_v38  ;;  %v208_v44 = vmul.f32 %v200_v37, %v200_v37 }
 0x198   :  { %v195_v41 = vpop.xlane.xlu0 %194 }
 0x199   :  { %v221_v43 = vadd.f32 1e-05, %v217_v39  ;;  %v204_v45 = vmul.f32 0.0078125, %v195_v41  ;;  %v206_v47 = vmul.f32 %v198_v40, %v198_v40 }
 0x19a   :  { %v191_v46 = vpop.xlane.xlu1 %190 }
 0x19b   :  { %932 = vrsqrt.f32 %v221_v43  ;;  %v212_v48 = vsub.f32 %v204_v45, %v208_v44  ;;  %v202_v49 = vmul.f32 0.0078125, %v191_v46 }
 0x19c   :  { %v193_v50 = vpop.xlane.xlu0 %192 }
 0x19d   :  { %v216_v52 = vmax.f32 %v212_v48, 0.0  ;;  %v210_v53 = vsub.f32 %v202_v49, %v206_v47  ;;  %v203_v54 = vmul.f32 0.0078125, %v193_v50  ;;  %v977_v50 = vmov 32  }
 0x19f   :  { %v214_v55 = vmax.f32 %v210_v53, 0.0  ;;  %v211_v56 = vsub.f32 %v203_v54, %v207_v51  ;;  %v220_v57 = vadd.f32 1e-05, %v216_v52 }
 0x1a1   :  { %v215_v58 = vmax.f32 %v211_v56, 0.0  ;;  %v218_v59 = vadd.f32 1e-05, %v214_v55  ;;  %934 = vrsqrt.f32 %v220_v57 }
 0x1a3   :  { %v219_v60 = vadd.f32 1e-05, %v215_v58 }
 0x1a5   :  { %936 = vrsqrt.f32 %v219_v60 }
 0x1a6   :  { %938 = vrsqrt.f32 %v218_v59 }
 0x1a8   :  { %v933_v61 = vpop.eup %932 }
 0x1a9   :  { %v229_v62 = vmul.f32 %v933_v61, %v1102_v19 }
 0x1ab   :  { %v233_v63 = vmul.f32 %v229_v62, %v201_v31 }
 0x1ad   :  { %244 = vrot.lane.b32.xlu0 %v233_v63, %s975_s20 }
 0x1ae   :  { %v935_v0 = vpop.eup %934 }
 0x1af   :  { %v228_v6 = vmul.f32 %v935_v0, %v1093_v18 }
 0x1b1   :  { %271 = vperm.xlu0 %921, %v229_v62   ;;  %v232_v8 = vmul.f32 %v228_v6, %v200_v37 }
 0x1b2   :  { %v937_v1 = vpop.eup %936 }
 0x1b3   :  { %v227_v2 = vmul.f32 %v937_v1, %v1088_v17  ;;  %v939_v4 = vpop.eup %938 }
 0x1b4   :  { %v226_v7 = vmul.f32 %v939_v4, %v1013_v3 }
 0x1b5   :  { %261 = vperm.xlu0 %921, %v227_v2   ;;  %v231_v5 = vmul.f32 %v227_v2, %v199_v42 }
 0x1b6   :  { %v230_v9 = vmul.f32 %v226_v7, %v198_v40 }
 0x1b7   :  { %240 = vrot.lane.b32.xlu1 %v231_v5, %s975_s20 }
 0x1b9   :  { %256 = vperm.xlu0 %921, %v226_v7  }
 0x1bb   :  { %242 = vrot.lane.b32.xlu1 %v232_v8, %s975_s20 }
 0x1bd   :  { %924 = vset.pattern.permute.xlu0 %v976_v10 }
 0x1bf   :  { %238 = vrot.lane.b32.xlu1 %v230_v9, %s975_s20 }
 0x1c3   :  { %266 = vperm.xlu1 %922, %v228_v6  }
 0x1c7   :  { %923 = vset.pattern.permute.xlu1 %v976_v10 }
 0x21f   :  { %v245_v11 = vpop.permute.xlu0 %244 }
 0x220   :  { %v253_v12 = vsub.f32 %v1102_v19, %v245_v11 }
 0x222   :  { %295 = vperm.xlu1 %923, %v253_v12  }
 0x229   :  { %v241_v13 = vpop.permute.xlu1 %240 }
 0x22a   :  { %v251_v23 = vsub.f32 %v1088_v17, %v241_v13 }
 0x22c   :  { %v272_v19 = vpop.permute.xlu0 %271 }
 0x22d   :  { %v243_v14 = vpop.permute.xlu1 %242 }
 0x22e   :  { %v252_v15 = vsub.f32 %v1093_v18, %v243_v14  ;;  %v277_v18 = vmul.f32 %v1111_v22, %v272_v19 }
 0x230   :  { %290 = vperm.xlu1 %923, %v252_v15  }
 0x231   :  { %v239_v16 = vpop.permute.xlu1 %238 }
 0x232   :  { %v250_v25 = vsub.f32 %v1013_v3, %v239_v16  ;;  %v262_v3 = vpop.permute.xlu0 %261 }
 0x233   :  { %v275_v34 = vmul.f32 %v1106_v20, %v262_v3  ;;  %v1157_v20 = vld [vmem:[%s1234_s1 + $0x30] sm:$0xff] }
 0x234   :  { %280 = vperm.xlu0 %924, %v250_v25   ;;  %285 = vperm.xlu1 %923, %v251_v23  }
 0x236   :  { %v257_v31 = vpop.permute.xlu0 %256 }
 0x237   :  { %v274_v35 = vmul.f32 %v257_v31, %v1109_v21  ;;  %v1166_v21 = vld [vmem:[%s1234_s1 + $0x38] sm:$0xff] }
 0x238   :  { %925 = vset.pattern.permute.xlu0 %v977_v50  ;;  %926 = vset.pattern.permute.xlu1 %v977_v50 }
 0x23e   :  { %v267_v27 = vpop.permute.xlu1 %266 }
 0x23f   :  { %v276_v30 = vmul.f32 %v267_v27, %v1116_v24  ;;  %v1152_v24 = vld [vmem:[%s1234_s1 + $0x28] sm:$0xff] }
 0x29d   :  { %v296_v28 = vpop.permute.xlu1 %295 }
 0x29e   :  { %v301_v29 = vadd.f32 %v296_v28, %v277_v18 }
 0x2a0   :  { %v305_v17 = vmax.f32 %v301_v29, 0.0 }
 0x2a2   :  { %880 = vmatprep.subr.mxu1 %v305_v17 }
 0x2a3   :  { %881 = vmatpush3.msra.mxu1 %v305_v17 }
 0x2ab   :  { %v291_v32 = vpop.permute.xlu1 %290 }
 0x2ac   :  { %v300_v33 = vadd.f32 %v291_v32, %v276_v30 }
 0x2ae   :  { %v304_v36 = vmax.f32 %v300_v33, 0.0 }
 0x2af   :  { %v286_v37 = vpop.permute.xlu1 %285  ;;  %v281_v38 = vpop.permute.xlu0 %280 }
 0x2b0   :  { %v299_v39 = vadd.f32 %v286_v37, %v275_v34  ;;  %v298_v22 = vadd.f32 %v281_v38, %v274_v35  ;;  %882 = vmatprep.subr.mxu1 %v304_v36 }
 0x2b1   :  { %883 = vmatpush3.msra.mxu1 %v304_v36  ;;  %v978_v36 = vmov 33  }
 0x2b2   :  { %v303_v40 = vmax.f32 %v299_v39, 0.0  ;;  %v302_v41 = vmax.f32 %v298_v22, 0.0 }
 0x2b4   :  { %884 = vmatprep.subr.mxu1 %v303_v40 }
 0x2b5   :  { %885 = vmatpush3.msra.mxu1 %v303_v40 }
 0x2b6   :  { %886 = vmatprep.subr.mxu1 %v302_v41 }
 0x2b7   :  { %887 = vmatpush3.msra.mxu1 %v302_v41 }
 0x2b8   :  { %889 = vmatmul.mubr.msk.f32.vlgmr.msra.gmra.mxu1 %vm310_vm1, %v1152_v24 }
 0x2b9   :  { %891 = vmatprep.mubr.msk.f32.mxu1 %vm310_vm1, %v1157_v20 }
 0x2bc   :  { %892 = vmatmul.mubr.msk.f32.gmra.mxu1 %vm310_vm1, %v1166_v21 }
 0x378   :  { %v1170_v42 = vpop.f32.mrf.mxu1 }
 0x379   :  { %410 = vadd.xlane.f32.xlu1 %v1170_v42  ;;  %v417_v49 = vmul.f32 %v1170_v42, %v1170_v42 }
 0x37a   :  { %v1173_v43 = vpop.f32.mrf.mxu1 }
 0x37b   :  { %v416_v47 = vmul.f32 %v1173_v43, %v1173_v43 }
 0x37c   :  { %v1175_v44 = vpop.f32.mrf.mxu1 }
 0x37d   :  { %414 = vadd.xlane.f32.xlu1 %v1175_v44  ;;  %v419_v46 = vmul.f32 %v1175_v44, %v1175_v44 }
 0x37e   :  { %v1178_v45 = vpop.f32.mrf.mxu1 }
 0x37f   :  { %412 = vadd.xlane.f32.xlu0 %v1178_v45  ;;  %v418_v48 = vmul.f32 %v1178_v45, %v1178_v45 }
 0x381   :  { %408 = vadd.xlane.f32.xlu1 %v1173_v43 }
 0x383   :  { %426 = vadd.xlane.f32.xlu0 %v419_v46 }
 0x385   :  { %420 = vadd.xlane.f32.xlu1 %v416_v47 }
 0x387   :  { %424 = vadd.xlane.f32.xlu0 %v418_v48  ;;  %v1209_v48 = vld [vmem:[%s1234_s1 + $0x40] sm:$0xff] }
 0x388   :  { %902 = vmatprep.mubr.msk.f32.mxu1 %vm310_vm1, %v1209_v48 }
 0x38b   :  { %422 = vadd.xlane.f32.xlu0 %v417_v49 }
 0x402   :  { %v411_v51 = vpop.xlane.xlu1 %410 }
 0x403   :  { %v429_v63 = vmul.f32 0.0078125, %v411_v51 }
 0x405   :  { %v437_v9 = vmul.f32 %v429_v63, %v429_v63 }
 0x406   :  { %v415_v52 = vpop.xlane.xlu1 %414 }
 0x407   :  { %v431_v54 = vmul.f32 0.0078125, %v415_v52 }
 0x408   :  { %v413_v53 = vpop.xlane.xlu0 %412 }
 0x409   :  { %v439_v57 = vmul.f32 %v431_v54, %v431_v54  ;;  %v430_v58 = vmul.f32 0.0078125, %v413_v53 }
 0x40a   :  { %v409_v55 = vpop.xlane.xlu1 %408 }
 0x40b   :  { %v428_v61 = vmul.f32 0.0078125, %v409_v55  ;;  %v438_v1 = vmul.f32 %v430_v58, %v430_v58 }
 0x40c   :  { %v427_v56 = vpop.xlane.xlu0 %426 }
 0x40d   :  { %v435_v59 = vmul.f32 0.0078125, %v427_v56  ;;  %v436_v6 = vmul.f32 %v428_v61, %v428_v61 }
 0x40e   :  { %v421_v60 = vpop.xlane.xlu1 %420 }
 0x40f   :  { %v443_v62 = vsub.f32 %v435_v59, %v439_v57  ;;  %v432_v4 = vmul.f32 0.0078125, %v421_v60 }
 0x410   :  { %v425_v0 = vpop.xlane.xlu0 %424 }
 0x411   :  { %v447_v2 = vmax.f32 %v443_v62, 0.0  ;;  %v434_v5 = vmul.f32 0.0078125, %v425_v0  ;;  %v440_v11 = vsub.f32 %v432_v4, %v436_v6 }
 0x413   :  { %v451_v7 = vadd.f32 1e-05, %v447_v2  ;;  %v442_v8 = vsub.f32 %v434_v5, %v438_v1  ;;  %v444_v16 = vmax.f32 %v440_v11, 0.0 }
 0x414   :  { %v423_v10 = vpop.xlane.xlu0 %422 }
 0x415   :  { %940 = vrsqrt.f32 %v451_v7  ;;  %v446_v12 = vmax.f32 %v442_v8, 0.0  ;;  %v433_v13 = vmul.f32 0.0078125, %v423_v10  ;;  %v448_v19 = vadd.f32 1e-05, %v444_v16 }
 0x417   :  { %v441_v14 = vsub.f32 %v433_v13, %v437_v9  ;;  %v450_v15 = vadd.f32 1e-05, %v446_v12 }
 0x419   :  { %v445_v23 = vmax.f32 %v441_v14, 0.0  ;;  %942 = vrsqrt.f32 %v450_v15 }
 0x41b   :  { %v449_v25 = vadd.f32 1e-05, %v445_v23 }
 0x41d   :  { %944 = vrsqrt.f32 %v449_v25 }
 0x41e   :  { %946 = vrsqrt.f32 %v448_v19 }
 0x422   :  { %v941_v27 = vpop.eup %940 }
 0x423   :  { %v459_v18 = vmul.f32 %v941_v27, %v1166_v21 }
 0x425   :  { %v463_v28 = vmul.f32 %v459_v18, %v431_v54 }
 0x426   :  { %v943_v29 = vpop.eup %942 }
 0x427   :  { %474 = vrot.lane.b32.xlu0 %v463_v28, %s975_s20  ;;  %v458_v31 = vmul.f32 %v943_v29, %v1157_v20 }
 0x429   :  { %v462_v34 = vmul.f32 %v458_v31, %v430_v58 }
 0x42a   :  { %v945_v17 = vpop.eup %944 }
 0x42b   :  { %501 = vperm.xlu0 %925, %v459_v18   ;;  %v457_v3 = vmul.f32 %v945_v17, %v1152_v24  ;;  %v947_v32 = vpop.eup %946 }
 0x42c   :  { %v456_v33 = vmul.f32 %v947_v32, %v1141_v26 }
 0x42d   :  { %v461_v30 = vmul.f32 %v457_v3, %v429_v63 }
 0x42e   :  { %v460_v35 = vmul.f32 %v456_v33, %v428_v61 }
 0x42f   :  { %491 = vperm.xlu0 %925, %v457_v3   ;;  %470 = vrot.lane.b32.xlu1 %v461_v30, %s975_s20 }
 0x433   :  { %486 = vperm.xlu0 %925, %v456_v33   ;;  %472 = vrot.lane.b32.xlu1 %v462_v34, %s975_s20  ;;  %v979_v33 = vmov 0.0   ;;  %v683_v34 = vld [vmem:[%s1234_s1 + $0x50] sm:$0x1] }
 0x437   :  { %468 = vrot.lane.b32.xlu1 %v460_v35, %s975_s20  ;;  %928 = vset.pattern.permute.xlu0 %v978_v36  ;;  %v981_v35 = vmov 16  }
 0x43b   :  { %496 = vperm.xlu1 %926, %v458_v31  }
 0x43f   :  { %927 = vset.pattern.permute.xlu1 %v978_v36 }
 0x499   :  { %v475_v37 = vpop.permute.xlu0 %474 }
 0x49a   :  { %v483_v38 = vsub.f32 %v1166_v21, %v475_v37 }
 0x49c   :  { %525 = vperm.xlu1 %927, %v483_v38  }
 0x4a1   :  { %v471_v39 = vpop.permute.xlu1 %470 }
 0x4a2   :  { %v481_v46 = vsub.f32 %v1152_v24, %v471_v39 }
 0x4a5   :  { %v473_v22 = vpop.permute.xlu1 %472 }
 0x4a6   :  { %v482_v40 = vsub.f32 %v1157_v20, %v473_v22  ;;  %v502_v21 = vpop.permute.xlu0 %501 }
 0x4a7   :  { %v507_v49 = vmul.f32 %v1175_v44, %v502_v21 }
 0x4a8   :  { %520 = vperm.xlu1 %927, %v482_v40  }
 0x4a9   :  { %v469_v41 = vpop.permute.xlu1 %468 }
 0x4aa   :  { %v480_v47 = vsub.f32 %v1141_v26, %v469_v41  ;;  %v492_v26 = vpop.permute.xlu0 %491 }
 0x4ab   :  { %v505_v57 = vmul.f32 %v1170_v42, %v492_v26 }
 0x4ac   :  { %510 = vperm.xlu0 %928, %v480_v47   ;;  %515 = vperm.xlu1 %927, %v481_v46  }
 0x4ae   :  { %v487_v54 = vpop.permute.xlu0 %486 }
 0x4af   :  { %v504_v58 = vmul.f32 %v487_v54, %v1173_v43 }
 0x4b0   :  { %929 = vset.pattern.permute.xlu1 %v977_v50 }
 0x4b6   :  { %v497_v20 = vpop.permute.xlu1 %496 }
 0x4b7   :  { %v506_v53 = vmul.f32 %v497_v20, %v1178_v45  ;;  %v537_v45 = vld [vmem:[%s1234_s1 + $0x48] sm:$0xff]  ;;  %s982_s1 = smov [#allocation2]  }
 0x4b8   :  { %s770_s7 = sshll.u32 %s982_s1, 4  ;;  %s771_s7 = int_to_ptr.vmem [resolvable:$true] %s770_s7 }
 0x4b9   :  { %s952_s8 = scalar_lea.vmem %s771_s7, 16  ;;  %s956_s9 = scalar_lea.vmem %s771_s7, 32 }
 0x4ba   :  { %p953_p0 = scmp.ne.s32.totalorder %s771_s7, %s952_s8  ;;  %p957_p1 = scmp.lt.s32.totalorder %s771_s7, %s771_s7 }
 0x4bb   :  { %p958_p2 = scmp.lt.s32.totalorder %s956_s9, %s952_s8 }
 0x4bd   :  { %p959_p3 = por %p958_p2, %p957_p1 }
 0x4bf   :  { %p960_p4 = pnand %p959_p3, %p953_p0 }
 0x517   :  { %v526_v51 = vpop.permute.xlu1 %525 }
 0x518   :  { %v531_v24 = vadd.f32 %v526_v51, %v507_v49 }
 0x51a   :  { %v535_v52 = vmax.f32 %v531_v24, 0.0 }
 0x51c   :  { %894 = vmatprep.subr.mxu1 %v535_v52 }
 0x51d   :  { %895 = vmatpush3.msra.mxu1 %v535_v52 }
 0x523   :  { %v521_v55 = vpop.permute.xlu1 %520 }
 0x524   :  { %v530_v56 = vadd.f32 %v521_v55, %v506_v53 }
 0x526   :  { %v534_v50 = vmax.f32 %v530_v56, 0.0 }
 0x527   :  { %v516_v59 = vpop.permute.xlu1 %515  ;;  %v511_v60 = vpop.permute.xlu0 %510 }
 0x528   :  { %v529_v61 = vadd.f32 %v516_v59, %v505_v57  ;;  %v528_v44 = vadd.f32 %v511_v60, %v504_v58  ;;  %896 = vmatprep.subr.mxu1 %v534_v50 }
 0x529   :  { %897 = vmatpush3.msra.mxu1 %v534_v50 }
 0x52a   :  { %v533_v62 = vmax.f32 %v529_v61, 0.0  ;;  %v532_v63 = vmax.f32 %v528_v44, 0.0 }
 0x52c   :  { %898 = vmatprep.subr.mxu1 %v533_v62 }
 0x52d   :  { %899 = vmatpush3.msra.mxu1 %v533_v62 }
 0x52e   :  { %900 = vmatprep.subr.mxu1 %v532_v63 }
 0x52f   :  { %901 = vmatpush3.msra.mxu1 %v532_v63 }
 0x530   :  { %903 = vmatmul.mubr.msk.f32.vlgmr.msra.gmra.mxu1 %vm310_vm1, %v537_v45  ;;  %905 = vmatprep.subr.mxu1 %v979_v33 }
 0x531   :  { %909 = vmatprep.mubr.msk.f32.mxu1 %vm980_vm2, %v979_v33 }
 0x5f0   :  { %v904_v42 = vpop.f32.mrf.mxu1 }
 0x5f1   :  { %621 = vadd.xlane.f32.xlu1 %v904_v42  ;;  %v624_v1 = vmul.f32 %v904_v42, %v904_v42 }
 0x5f2   :  { %v610_v43 = vpop.f32.mrf.mxu1 }
 0x5f3   :  { %619 = vadd.xlane.f32.xlu0 %v610_v43  ;;  %v623_v0 = vmul.f32 %v610_v43, %v610_v43 }
 0x5f5   :  { %625 = vadd.xlane.f32.xlu1 %v623_v0 }
 0x5f7   :  { %627 = vadd.xlane.f32.xlu0 %v624_v1 }
 0x67a   :  { %v622_v2 = vpop.xlane.xlu1 %621 }
 0x67b   :  { %v630_v5 = vmul.f32 0.0078125, %v622_v2 }
 0x67c   :  { %v620_v4 = vpop.xlane.xlu0 %619 }
 0x67d   :  { %v629_v6 = vmul.f32 0.0078125, %v620_v4  ;;  %v634_v11 = vmul.f32 %v630_v5, %v630_v5 }
 0x67e   :  { %v626_v7 = vpop.xlane.xlu1 %625 }
 0x67f   :  { %v633_v8 = vmul.f32 %v629_v6, %v629_v6  ;;  %v631_v9 = vmul.f32 0.0078125, %v626_v7 }
 0x680   :  { %v628_v10 = vpop.xlane.xlu0 %627 }
 0x681   :  { %v635_v12 = vsub.f32 %v631_v9, %v633_v8  ;;  %v632_v13 = vmul.f32 0.0078125, %v628_v10 }
 0x683   :  { %v637_v14 = vmax.f32 %v635_v12, 0.0  ;;  %v636_v15 = vsub.f32 %v632_v13, %v634_v11 }
 0x685   :  { %v639_v16 = vadd.f32 1e-05, %v637_v14  ;;  %v638_v23 = vmax.f32 %v636_v15, 0.0 }
 0x687   :  { %948 = vrsqrt.f32 %v639_v16  ;;  %v640_v25 = vadd.f32 1e-05, %v638_v23 }
 0x689   :  { %950 = vrsqrt.f32 %v640_v25 }
 0x694   :  { %v949_v19 = vpop.eup %948 }
 0x695   :  { %v643_v27 = vmul.f32 %v949_v19, %v1209_v48 }
 0x696   :  { %v951_v18 = vpop.eup %950 }
 0x697   :  { %v645_v28 = vmul.f32 %v643_v27, %v629_v6  ;;  %v644_v29 = vmul.f32 %v951_v18, %v537_v45 }
 0x699   :  { %649 = vrot.lane.b32.xlu1 %v645_v28, %s975_s20  ;;  %v646_v17 = vmul.f32 %v644_v29, %v630_v5 }
 0x69b   :  { %651 = vrot.lane.b32.xlu0 %v646_v17, %s975_s20 }
 0x69d   :  { %664 = vperm.xlu1 %929, %v644_v29  }
 0x6a1   :  { %659 = vperm.xlu1 %929, %v643_v27  }
 0x6a5   :  { %930 = vset.pattern.permute.xlu1 %v978_v36 }
 0x70b   :  { %v650_v3 = vpop.permute.xlu1 %649 }
 0x70c   :  { %v655_v30 = vsub.f32 %v1209_v48, %v650_v3 }
 0x70d   :  { %v652_v31 = vpop.permute.xlu0 %651 }
 0x70e   :  { %v656_v32 = vsub.f32 %v537_v45, %v652_v31  ;;  %671 = vperm.xlu1 %930, %v655_v30  }
 0x710   :  { %676 = vperm.xlu0 %928, %v656_v32  }
 0x714   :  { %931 = vset.pattern.permute.xlu0 %v981_v35 }
 0x715   :  { %686 = vperm.xlu0 %931, %v683_v34  }
 0x718   :  { %v665_v37 = vpop.permute.xlu1 %664 }
 0x719   :  { %v668_v39 = vmul.f32 %v904_v42, %v665_v37 }
 0x71c   :  { %v660_v36 = vpop.permute.xlu1 %659 }
 0x71d   :  { %v667_v22 = vmul.f32 %v660_v36, %v610_v43 }
 0x789   :  { %v672_v38 = vpop.permute.xlu1 %671 }
 0x78a   :  { %v679_v41 = vadd.f32 %v672_v38, %v667_v22 }
 0x78b   :  { %v677_v40 = vpop.permute.xlu0 %676 }
 0x78c   :  { %v680_v46 = vadd.f32 %v677_v40, %v668_v39  ;;  %v681_v48 = vmax.f32 %v679_v41, 0.0 }
 0x78e   :  { %v682_v47 = vmax.f32 %v680_v46, 0.0 }
 0x790   :  { %906 = vmatpush3.msra.mxu1 %v682_v47  ;;  %v687_v21 = vpop.permute.xlu0 %686 }
 0x791   :  { %907 = vmatprep.subr.mxu1 %v979_v33 }
 0x792   :  { %908 = vmatpush3.msra.mxu1 %v681_v48 }
 0x793   :  { %910 = vmatmul.mubr.msk.f32.vlgmr.msra.gmra.mxu1 %vm689_vm3, %v683_v34 }
 0x853   :  { %v758_v20 = vpop.f32.mrf.mxu1 }
 0x854   :  { %v759_v49 = vadd.f32 %v758_v20, %v687_v21 }
 0x855   :  { %v911_v51 = vpop.f32.mrf.mxu1 }
 0x856   :  { %v762_v24 = vmax.f32 %v759_v49, 0.0 }
 0x858   :  { %763 = vst [vmem:[#allocation2] sm:$0x1] %v762_v24 }
 0x859   :  { %963 = shalt.err (!%p960_p4)
}
 0x85a   :  { %773 = dma.vmem_to_hbm [thread:$0]  %s771_s7, 16, %s1235_s2, [#allocation3]  }
 0x85b   :  { %972 = dma.done.wait [#allocation3], 16  }
 0x85c   :  { %973 = vsyncadd [#allocation3], 4294967280 }
 0x85d   :  { %777 = vsyncpa [#allocation3], 1 }

</bundles_post_ra>
